<compile_context>
chip_gen: v7x
topology: tpu7x:2x2x1
jax: 0.10.0
libtpu: 0.0.40
codegen_flags: <defaults>
</compile_context>

<pallas_src>
import jax
import jax.numpy as jnp
from jax.experimental import pallas as pl
from jax.experimental.pallas import tpu as pltpu


def _conv1x1_cf_kernel(x_ref, w_ref, o_ref):
    # x_ref: (1, Cin, M)  activation tile, channels-first (M = H*W)
    # w_ref: (Cout, Cin)  full weight
    # o_ref: (1, Cout, M) output tile
    x = x_ref[0].astype(jnp.bfloat16)            # (Cin, M)   VPU cast, cheap
    w = w_ref[...].astype(jnp.bfloat16)          # (Cout, Cin)
    y = jnp.dot(w, x, preferred_element_type=jnp.float32)   # (Cout, M) on MXU
    o_ref[0] = y.astype(o_ref.dtype)


def conv2d_1x1(x_nchw, weight_oi):
    """1x1 conv, stride 1, no bias, computed as a channels-first matmul.

    x_nchw:    (N, Cin, H, W)  float32
    weight_oi: (Cout, Cin)     float32 (PyTorch (Cout, Cin, 1, 1) squeezed)
    returns    (N, Cout, H, W) float32
    """
    N, Cin, H, W = x_nchw.shape
    Cout = weight_oi.shape[0]
    M = H * W

    # Free reshape for contiguous NCHW input (no data movement).
    x3d = x_nchw.reshape(N, Cin, M)

    flops = 2 * N * M * Cin * Cout
    bytes_accessed = 4 * (N * Cin * M + Cout * Cin + N * Cout * M)

    out3d = pl.pallas_call(
        _conv1x1_cf_kernel,
        out_shape=jax.ShapeDtypeStruct((N, Cout, M), x_nchw.dtype),
        grid_spec=pltpu.PrefetchScalarGridSpec(
            num_scalar_prefetch=0,
            grid=(N,),
            in_specs=[
                # Whole (Cin, M) slab per image; Cin=672 and Cout=112 are
                # sublane-aligned (multiples of 8), M=196 equals the full
                # array dim so the blocks are legal and fit easily in VMEM.
                pl.BlockSpec((1, Cin, M), lambda n: (n, 0, 0)),
                pl.BlockSpec((Cout, Cin), lambda n: (0, 0)),
            ],
            out_specs=pl.BlockSpec((1, Cout, M), lambda n: (n, 0, 0)),
        ),
        compiler_params=pltpu.CompilerParams(
            # Batch axis is independent -> lets megacore (v7x) split images.
            dimension_semantics=("parallel",),
        ),
        cost_estimate=pl.CostEstimate(
            flops=flops, transcendentals=0, bytes_accessed=bytes_accessed
        ),
    )(x3d, weight_oi)

    # Free reshape back to NCHW.
    return out3d.reshape(N, Cout, H, W)


if __name__ == "__main__":
    key = jax.random.PRNGKey(0)
    kx, kw = jax.random.split(key)

    # Shapes from the module: Conv2d(672, 112, 1x1), input (1, 672, 14, 14).
    N, Cin, Cout, H, W = 1, 672, 112, 14, 14

    x = jax.random.normal(kx, (N, Cin, H, W), dtype=jnp.float32)
    # Deterministic synthetic weight, (Cout, Cin) == (Cout, Cin, 1, 1) squeezed.
    weight = jax.random.normal(kw, (Cout, Cin), dtype=jnp.float32) * 0.02

    out = conv2d_1x1(x, weight)
    out = jax.block_until_ready(out)

    # Reference: plain f32 einsum over channels.
    ref = jnp.einsum("nchw,oc->nohw", x, weight)
    assert out.shape == (N, Cout, H, W)
    # bf16 MXU inputs with f32 accumulation -> slightly looser tolerance.
    assert jnp.allclose(out, ref, atol=2e-2, rtol=2e-2)

    print("KERNEL_OK")
</pallas_src>

<mosaic_0001>
module attributes {stable_mosaic.version = 11 : i64} {
  func.func @_conv1x1_cf_kernel(%arg0: i32, %arg1: memref<1x672x196xf32, #tpu.memory_space<vmem>>, %arg2: memref<112x672xf32, #tpu.memory_space<vmem>>, %arg3: memref<1x112x196xf32, #tpu.memory_space<vmem>>) attributes {dimension_semantics = [#tpu.dimension_semantics<parallel>], iteration_bounds = array<i64: 1>, scalar_prefetch = 0 : i64, scratch_operands = 0 : i64, tpu.core_type = #tpu.core_type<tc>, window_params = [{transform_indices = @transform_0, window_bounds = array<i64: 1, 672, 196>}, {pipeline_mode = #tpu.pipeline_mode<synchronous>, transform_indices = @transform_1, window_bounds = array<i64: 112, 672>}, {transform_indices = @transform_2, window_bounds = array<i64: 1, 112, 196>}]} {
    %c0 = arith.constant 0 : index
    %c0_0 = arith.constant 0 : index
    %c0_1 = arith.constant 0 : index
    %0 = vector.load %arg1[%c0, %c0_0, %c0_1] : memref<1x672x196xf32, #tpu.memory_space<vmem>>, vector<1x672x196xf32>
    %1 = vector.shape_cast %0 : vector<1x672x196xf32> to vector<672x196xf32>
    %2 = arith.truncf %1 : vector<672x196xf32> to vector<672x196xbf16>
    %c0_2 = arith.constant 0 : index
    %c0_3 = arith.constant 0 : index
    %3 = vector.load %arg2[%c0_2, %c0_3] : memref<112x672xf32, #tpu.memory_space<vmem>>, vector<112x672xf32>
    %4 = arith.truncf %3 : vector<112x672xf32> to vector<112x672xbf16>
    %cst = arith.constant dense<0.000000e+00> : vector<112x196xf32>
    %5 = tpu.matmul %4, %2, %cst {dimension_numbers = #tpu.dot_dimension_numbers<[1], [0], [0], [1], [0, 0, 1, 1], [], []>} : vector<112x672xbf16>, vector<672x196xbf16>, vector<112x196xf32> -> vector<112x196xf32>
    %c0_4 = arith.constant 0 : index
    %c0_5 = arith.constant 0 : index
    %c0_6 = arith.constant 0 : index
    %6 = vector.load %arg3[%c0_4, %c0_5, %c0_6] : memref<1x112x196xf32, #tpu.memory_space<vmem>>, vector<1x112x196xf32>
    %7 = vector.shape_cast %6 : vector<1x112x196xf32> to vector<112x196xf32>
    %8 = vector.shape_cast %5 : vector<112x196xf32> to vector<1x112x196xf32>
    tpu.vector_store %arg3[%c0_4, %c0_5, %c0_6], %8 {strides = array<i32>} : memref<1x112x196xf32, #tpu.memory_space<vmem>>, vector<1x112x196xf32>,
    return
  }
  func.func @transform_0(%arg0: i32) -> (i32, i32, i32) {
    %c0_i32 = arith.constant 0 : i32
    %c0_i32_0 = arith.constant 0 : i32
    %c0_i32_1 = arith.constant 0 : i32
    return %arg0, %c0_i32, %c0_i32_0 : i32, i32, i32
  }
  func.func @transform_1(%arg0: i32) -> (i32, i32) {
    %c0_i32 = arith.constant 0 : i32
    %c0_i32_0 = arith.constant 0 : i32
    %c0_i32_1 = arith.constant 0 : i32
    return %c0_i32, %c0_i32_0 : i32, i32
  }
  func.func @transform_2(%arg0: i32) -> (i32, i32, i32) {
    %c0_i32 = arith.constant 0 : i32
    %c0_i32_0 = arith.constant 0 : i32
    %c0_i32_1 = arith.constant 0 : i32
    return %arg0, %c0_i32, %c0_i32_0 : i32, i32, i32
  }
}

</mosaic_0001>

<bundles_post_ra>
// kernel: tpu_custom_call.1
= control target key start
LH: loop header
LB: loop body
LE: loop exit
PB: predicated region body
PF: predicated region fallthrough
CT: control target
= control target key end

     0   :  { %vm390_vm0 = vcmask 261120   ;;  %vm722_vm1 = vcmask 556032   ;;  %s1761_s0 = inlined_call_operand.vmem [shape: f32[1,672,196], index: 0, kind: input, shape index: {}]   ;;  %s1762_s1 = inlined_call_operand.vmem [shape: f32[112,672], index: 1, kind: input, shape index: {}]   ;;  %s1763_s2 = inlined_call_operand.vmem [shape: f32[1,112,196], index: 2, kind: output, shape index: {}]  }
   0x1   :  { %v13_v0 = vld [vmem:[%s1761_s0 + $0x8] sm:$0xff]  ;;  %v15_v1 = vld [vmem:[%s1761_s0 + $0x18] sm:$0xff]  ;;  %v12_v5 = vld [vmem:[%s1761_s0] sm:$0xff] }
   0x2   :  { %v77_v2 = vld [vmem:[%s1761_s0 + $0x208] sm:$0xff]  ;;  %v181_v3 = vpack.c.bf16 %v15_v1, %v13_v0  ;;  %v79_v4 = vld [vmem:[%s1761_s0 + $0x218] sm:$0xff]  ;;  %v14_v6 = vld [vmem:[%s1761_s0 + $0x10] sm:$0xff] }
   0x3   :  { %v213_v7 = vpack.c.bf16 %v79_v4, %v77_v2  ;;  %v180_v8 = vpack.c.bf16 %v14_v6, %v12_v5  ;;  %v76_v9 = vld [vmem:[%s1761_s0 + $0x200] sm:$0xff]  ;;  %v78_v10 = vld [vmem:[%s1761_s0 + $0x210] sm:$0xff]  ;;  %v17_v11 = vld [vmem:[%s1761_s0 + $0x28] sm:$0xff] }
   0x4   :  { %412 = vmatprep.subr.bf16.mxu1 %v181_v3  ;;  %v212_v12 = vpack.c.bf16 %v78_v10, %v76_v9  ;;  %v19_v13 = vld [vmem:[%s1761_s0 + $0x38] sm:$0xff]  ;;  %v81_v14 = vld [vmem:[%s1761_s0 + $0x228] sm:$0xff]  ;;  %v16_v18 = vld [vmem:[%s1761_s0 + $0x20] sm:$0xff] }
   0x5   :  { %v83_v15 = vld [vmem:[%s1761_s0 + $0x238] sm:$0xff]  ;;  %515 = vmatprep.subr.bf16.mxu0 %v213_v7  ;;  %413 = vmatpush1.bf16.msra.mxu1 %v180_v8  ;;  %v183_v16 = vpack.c.bf16 %v19_v13, %v17_v11  ;;  %v18_v19 = vld [vmem:[%s1761_s0 + $0x30] sm:$0xff]  ;;  %v80_v20 = vld [vmem:[%s1761_s0 + $0x220] sm:$0xff] }
   0x6   :  { %v215_v17 = vpack.c.bf16 %v83_v15, %v81_v14  ;;  %516 = vmatpush1.bf16.msra.mxu0 %v212_v12  ;;  %v182_v21 = vpack.c.bf16 %v18_v19, %v16_v18  ;;  %v82_v22 = vld [vmem:[%s1761_s0 + $0x230] sm:$0xff]  ;;  %v21_v23 = vld [vmem:[%s1761_s0 + $0x48] sm:$0xff]  ;;  %v23_v24 = vld [vmem:[%s1761_s0 + $0x58] sm:$0xff] }
   0x7   :  { %414 = vmatprep.subr.bf16.mxu1 %v183_v16  ;;  %v214_v25 = vpack.c.bf16 %v82_v22, %v80_v20  ;;  %v185_v26 = vpack.c.bf16 %v23_v24, %v21_v23  ;;  %v85_v27 = vld [vmem:[%s1761_s0 + $0x248] sm:$0xff]  ;;  %v87_v28 = vld [vmem:[%s1761_s0 + $0x258] sm:$0xff]  ;;  %v20_v29 = vld [vmem:[%s1761_s0 + $0x40] sm:$0xff] }
   0x8   :  { %517 = vmatprep.subr.bf16.mxu0 %v215_v17  ;;  %v217_v30 = vpack.c.bf16 %v87_v28, %v85_v27  ;;  %v22_v31 = vld [vmem:[%s1761_s0 + $0x50] sm:$0xff]  ;;  %v84_v32 = vld [vmem:[%s1761_s0 + $0x240] sm:$0xff]  ;;  %v25_v35 = vld [vmem:[%s1761_s0 + $0x68] sm:$0xff] }
   0x9   :  { %v86_v33 = vld [vmem:[%s1761_s0 + $0x250] sm:$0xff]  ;;  %415 = vmatpush1.bf16.msra.mxu1 %v182_v21  ;;  %v184_v34 = vpack.c.bf16 %v22_v31, %v20_v29  ;;  %v27_v36 = vld [vmem:[%s1761_s0 + $0x78] sm:$0xff]  ;;  %v89_v37 = vld [vmem:[%s1761_s0 + $0x268] sm:$0xff] }
   0xa   :  { %518 = vmatpush1.bf16.msra.mxu0 %v214_v25  ;;  %416 = vmatprep.subr.bf16.mxu1 %v185_v26  ;;  %v216_v38 = vpack.c.bf16 %v86_v33, %v84_v32  ;;  %v187_v39 = vpack.c.bf16 %v27_v36, %v25_v35  ;;  %v91_v40 = vld [vmem:[%s1761_s0 + $0x278] sm:$0xff]  ;;  %v24_v41 = vld [vmem:[%s1761_s0 + $0x60] sm:$0xff]  ;;  %v26_v42 = vld [vmem:[%s1761_s0 + $0x70] sm:$0xff] }
   0xb   :  { %519 = vmatprep.subr.bf16.mxu0 %v217_v30  ;;  %v219_v43 = vpack.c.bf16 %v91_v40, %v89_v37  ;;  %v88_v44 = vld [vmem:[%s1761_s0 + $0x260] sm:$0xff]  ;;  %v90_v45 = vld [vmem:[%s1761_s0 + $0x270] sm:$0xff]  ;;  %v29_v46 = vld [vmem:[%s1761_s0 + $0x88] sm:$0xff]  ;;  %v186_v50 = vpack.c.bf16 %v26_v42, %v24_v41 }
   0xc   :  { %v31_v47 = vld [vmem:[%s1761_s0 + $0x98] sm:$0xff]  ;;  %v93_v48 = vld [vmem:[%s1761_s0 + $0x288] sm:$0xff]  ;;  %v218_v51 = vpack.c.bf16 %v90_v45, %v88_v44  ;;  %v28_v53 = vld [vmem:[%s1761_s0 + $0x80] sm:$0xff] }
   0xd   :  { %v95_v49 = vld [vmem:[%s1761_s0 + $0x298] sm:$0xff]  ;;  %417 = vmatpush1.bf16.msra.mxu1 %v184_v34  ;;  %v189_v52 = vpack.c.bf16 %v31_v47, %v29_v46  ;;  %v30_v54 = vld [vmem:[%s1761_s0 + $0x90] sm:$0xff]  ;;  %v92_v55 = vld [vmem:[%s1761_s0 + $0x280] sm:$0xff] }
   0xe   :  { %520 = vmatpush1.bf16.msra.mxu0 %v216_v38  ;;  %418 = vmatprep.subr.bf16.mxu1 %v187_v39  ;;  %v221_v56 = vpack.c.bf16 %v95_v49, %v93_v48  ;;  %v94_v57 = vld [vmem:[%s1761_s0 + $0x290] sm:$0xff]  ;;  %v33_v58 = vld [vmem:[%s1761_s0 + $0xa8] sm:$0xff]  ;;  %v35_v59 = vld [vmem:[%s1761_s0 + $0xb8] sm:$0xff]  ;;  %v188_v62 = vpack.c.bf16 %v30_v54, %v28_v53 }
   0xf   :  { %521 = vmatprep.subr.bf16.mxu0 %v219_v43  ;;  %v97_v60 = vld [vmem:[%s1761_s0 + $0x2a8] sm:$0xff]  ;;  %v99_v61 = vld [vmem:[%s1761_s0 + $0x2b8] sm:$0xff]  ;;  %v220_v63 = vpack.c.bf16 %v94_v57, %v92_v55  ;;  %v191_v0 = vpack.c.bf16 %v35_v59, %v33_v58  ;;  %v32_v1 = vld [vmem:[%s1761_s0 + $0xa0] sm:$0xff] }
  0x10   :  { %v34_v2 = vld [vmem:[%s1761_s0 + $0xb0] sm:$0xff]  ;;  %v96_v3 = vld [vmem:[%s1761_s0 + $0x2a0] sm:$0xff]  ;;  %v223_v4 = vpack.c.bf16 %v99_v61, %v97_v60  ;;  %v37_v6 = vld [vmem:[%s1761_s0 + $0xc8] sm:$0xff] }
  0x11   :  { %419 = vmatpush1.bf16.msra.mxu1 %v186_v50  ;;  %v98_v5 = vld [vmem:[%s1761_s0 + $0x2b0] sm:$0xff]  ;;  %v39_v7 = vld [vmem:[%s1761_s0 + $0xd8] sm:$0xff]  ;;  %v101_v8 = vld [vmem:[%s1761_s0 + $0x2c8] sm:$0xff]  ;;  %v190_v10 = vpack.c.bf16 %v34_v2, %v32_v1 }
  0x12   :  { %522 = vmatpush1.bf16.msra.mxu0 %v218_v51  ;;  %420 = vmatprep.subr.bf16.mxu1 %v189_v52  ;;  %v103_v9 = vld [vmem:[%s1761_s0 + $0x2d8] sm:$0xff]  ;;  %v222_v11 = vpack.c.bf16 %v98_v5, %v96_v3  ;;  %v193_v12 = vpack.c.bf16 %v39_v7, %v37_v6  ;;  %v36_v13 = vld [vmem:[%s1761_s0 + $0xc0] sm:$0xff]  ;;  %v38_v14 = vld [vmem:[%s1761_s0 + $0xd0] sm:$0xff] }
  0x13   :  { %523 = vmatprep.subr.bf16.mxu0 %v221_v56  ;;  %v100_v15 = vld [vmem:[%s1761_s0 + $0x2c0] sm:$0xff]  ;;  %v225_v16 = vpack.c.bf16 %v103_v9, %v101_v8  ;;  %v102_v17 = vld [vmem:[%s1761_s0 + $0x2d0] sm:$0xff]  ;;  %v41_v18 = vld [vmem:[%s1761_s0 + $0xe8] sm:$0xff]  ;;  %v192_v22 = vpack.c.bf16 %v38_v14, %v36_v13 }
  0x14   :  { %v43_v19 = vld [vmem:[%s1761_s0 + $0xf8] sm:$0xff]  ;;  %v105_v20 = vld [vmem:[%s1761_s0 + $0x2e8] sm:$0xff]  ;;  %v224_v23 = vpack.c.bf16 %v102_v17, %v100_v15  ;;  %v40_v25 = vld [vmem:[%s1761_s0 + $0xe0] sm:$0xff] }
  0x15   :  { %421 = vmatpush1.bf16.msra.mxu1 %v188_v62  ;;  %v107_v21 = vld [vmem:[%s1761_s0 + $0x2f8] sm:$0xff]  ;;  %v195_v24 = vpack.c.bf16 %v43_v19, %v41_v18  ;;  %v42_v26 = vld [vmem:[%s1761_s0 + $0xf0] sm:$0xff]  ;;  %v104_v27 = vld [vmem:[%s1761_s0 + $0x2e0] sm:$0xff] }
  0x16   :  { %524 = vmatpush1.bf16.msra.mxu0 %v220_v63  ;;  %422 = vmatprep.subr.bf16.mxu1 %v191_v0  ;;  %v227_v28 = vpack.c.bf16 %v107_v21, %v105_v20  ;;  %v106_v29 = vld [vmem:[%s1761_s0 + $0x2f0] sm:$0xff]  ;;  %v45_v30 = vld [vmem:[%s1761_s0 + $0x108] sm:$0xff]  ;;  %v47_v31 = vld [vmem:[%s1761_s0 + $0x118] sm:$0xff]  ;;  %v194_v34 = vpack.c.bf16 %v42_v26, %v40_v25 }
  0x17   :  { %525 = vmatprep.subr.bf16.mxu0 %v223_v4  ;;  %v109_v32 = vld [vmem:[%s1761_s0 + $0x308] sm:$0xff]  ;;  %v111_v33 = vld [vmem:[%s1761_s0 + $0x318] sm:$0xff]  ;;  %v226_v35 = vpack.c.bf16 %v106_v29, %v104_v27  ;;  %v197_v36 = vpack.c.bf16 %v47_v31, %v45_v30  ;;  %v44_v37 = vld [vmem:[%s1761_s0 + $0x100] sm:$0xff] }
  0x18   :  { %v46_v38 = vld [vmem:[%s1761_s0 + $0x110] sm:$0xff]  ;;  %v108_v39 = vld [vmem:[%s1761_s0 + $0x300] sm:$0xff]  ;;  %v229_v40 = vpack.c.bf16 %v111_v33, %v109_v32  ;;  %v49_v42 = vld [vmem:[%s1761_s0 + $0x128] sm:$0xff] }
  0x19   :  { %423 = vmatpush1.bf16.msra.mxu1 %v190_v10  ;;  %v110_v41 = vld [vmem:[%s1761_s0 + $0x310] sm:$0xff]  ;;  %v51_v43 = vld [vmem:[%s1761_s0 + $0x138] sm:$0xff]  ;;  %v113_v44 = vld [vmem:[%s1761_s0 + $0x328] sm:$0xff]  ;;  %v196_v46 = vpack.c.bf16 %v46_v38, %v44_v37 }
  0x1a   :  { %526 = vmatpush1.bf16.msra.mxu0 %v222_v11  ;;  %424 = vmatprep.subr.bf16.mxu1 %v193_v12  ;;  %v115_v45 = vld [vmem:[%s1761_s0 + $0x338] sm:$0xff]  ;;  %v228_v47 = vpack.c.bf16 %v110_v41, %v108_v39  ;;  %v199_v48 = vpack.c.bf16 %v51_v43, %v49_v42  ;;  %v48_v49 = vld [vmem:[%s1761_s0 + $0x120] sm:$0xff]  ;;  %v50_v50 = vld [vmem:[%s1761_s0 + $0x130] sm:$0xff] }
  0x1b   :  { %527 = vmatprep.subr.bf16.mxu0 %v225_v16  ;;  %v112_v51 = vld [vmem:[%s1761_s0 + $0x320] sm:$0xff]  ;;  %v231_v52 = vpack.c.bf16 %v115_v45, %v113_v44  ;;  %v114_v53 = vld [vmem:[%s1761_s0 + $0x330] sm:$0xff]  ;;  %v53_v54 = vld [vmem:[%s1761_s0 + $0x148] sm:$0xff]  ;;  %v198_v58 = vpack.c.bf16 %v50_v50, %v48_v49 }
  0x1c   :  { %v55_v55 = vld [vmem:[%s1761_s0 + $0x158] sm:$0xff]  ;;  %v117_v56 = vld [vmem:[%s1761_s0 + $0x348] sm:$0xff]  ;;  %v230_v59 = vpack.c.bf16 %v114_v53, %v112_v51  ;;  %v52_v61 = vld [vmem:[%s1761_s0 + $0x140] sm:$0xff] }
  0x1d   :  { %425 = vmatpush1.bf16.msra.mxu1 %v192_v22  ;;  %v119_v57 = vld [vmem:[%s1761_s0 + $0x358] sm:$0xff]  ;;  %v201_v60 = vpack.c.bf16 %v55_v55, %v53_v54  ;;  %v54_v62 = vld [vmem:[%s1761_s0 + $0x150] sm:$0xff]  ;;  %v116_v63 = vld [vmem:[%s1761_s0 + $0x340] sm:$0xff] }
  0x1e   :  { %528 = vmatpush1.bf16.msra.mxu0 %v224_v23  ;;  %426 = vmatprep.subr.bf16.mxu1 %v195_v24  ;;  %v233_v0 = vpack.c.bf16 %v119_v57, %v117_v56  ;;  %v118_v1 = vld [vmem:[%s1761_s0 + $0x350] sm:$0xff]  ;;  %v57_v2 = vld [vmem:[%s1761_s0 + $0x168] sm:$0xff]  ;;  %v59_v3 = vld [vmem:[%s1761_s0 + $0x178] sm:$0xff]  ;;  %v200_v6 = vpack.c.bf16 %v54_v62, %v52_v61 }
  0x1f   :  { %529 = vmatprep.subr.bf16.mxu0 %v227_v28  ;;  %v121_v4 = vld [vmem:[%s1761_s0 + $0x368] sm:$0xff]  ;;  %v123_v5 = vld [vmem:[%s1761_s0 + $0x378] sm:$0xff]  ;;  %v56_v7 = vld [vmem:[%s1761_s0 + $0x160] sm:$0xff]  ;;  %v232_v10 = vpack.c.bf16 %v118_v1, %v116_v63  ;;  %v203_v11 = vpack.c.bf16 %v59_v3, %v57_v2 }
  0x20   :  { %v58_v8 = vld [vmem:[%s1761_s0 + $0x170] sm:$0xff]  ;;  %v120_v9 = vld [vmem:[%s1761_s0 + $0x360] sm:$0xff]  ;;  %v61_v13 = vld [vmem:[%s1761_s0 + $0x188] sm:$0xff]  ;;  %v235_v15 = vpack.c.bf16 %v123_v5, %v121_v4 }
  0x21   :  { %427 = vmatpush1.bf16.msra.mxu1 %v194_v34  ;;  %v122_v12 = vld [vmem:[%s1761_s0 + $0x370] sm:$0xff]  ;;  %v63_v14 = vld [vmem:[%s1761_s0 + $0x198] sm:$0xff]  ;;  %v125_v16 = vld [vmem:[%s1761_s0 + $0x388] sm:$0xff]  ;;  %v202_v22 = vpack.c.bf16 %v58_v8, %v56_v7 }
  0x22   :  { %530 = vmatpush1.bf16.msra.mxu0 %v226_v35  ;;  %428 = vmatprep.subr.bf16.mxu1 %v197_v36  ;;  %v127_v17 = vld [vmem:[%s1761_s0 + $0x398] sm:$0xff]  ;;  %v265_v18 = vld [vmem:[%s1762_s1 + $0x8] sm:$0xff]  ;;  %v234_v25 = vpack.c.bf16 %v122_v12, %v120_v9  ;;  %v205_v26 = vpack.c.bf16 %v63_v14, %v61_v13  ;;  %v60_v27 = vld [vmem:[%s1761_s0 + $0x180] sm:$0xff] }
  0x23   :  { %531 = vmatprep.subr.bf16.mxu0 %v229_v40  ;;  %v271_v19 = vld [vmem:[%s1762_s1 + $0x38] sm:$0xff]  ;;  %v273_v21 = vld [vmem:[%s1762_s1 + $0x48] sm:$0xff]  ;;  %v62_v28 = vld [vmem:[%s1761_s0 + $0x190] sm:$0xff]  ;;  %v237_v30 = vpack.c.bf16 %v127_v17, %v125_v16 }
  0x24   :  { %v267_v20 = vld [vmem:[%s1762_s1 + $0x18] sm:$0xff]  ;;  %v349_v23 = vpack.c.bf16 %v271_v19, %v265_v18  ;;  %v124_v29 = vld [vmem:[%s1761_s0 + $0x380] sm:$0xff]  ;;  %v126_v31 = vld [vmem:[%s1761_s0 + $0x390] sm:$0xff]  ;;  %v204_v36 = vpack.c.bf16 %v62_v28, %v60_v27 }
  0x25   :  { %429 = vmatpush1.bf16.msra.mxu1 %v196_v46  ;;  %v351_v24 = vpack.c.bf16 %v273_v21, %v267_v20  ;;  %v65_v32 = vld [vmem:[%s1761_s0 + $0x1a8] sm:$0xff]  ;;  %v67_v33 = vld [vmem:[%s1761_s0 + $0x1b8] sm:$0xff]  ;;  %v236_v37 = vpack.c.bf16 %v126_v31, %v124_v29  ;;  %v64_v39 = vld [vmem:[%s1761_s0 + $0x1a0] sm:$0xff] }
  0x26   :  { %532 = vmatpush1.bf16.msra.mxu0 %v228_v47  ;;  %430 = vmatprep.subr.bf16.mxu1 %v199_v48  ;;  %v129_v34 = vld [vmem:[%s1761_s0 + $0x3a8] sm:$0xff]  ;;  %v131_v35 = vld [vmem:[%s1761_s0 + $0x3b8] sm:$0xff]  ;;  %v207_v38 = vpack.c.bf16 %v67_v33, %v65_v32  ;;  %v66_v40 = vld [vmem:[%s1761_s0 + $0x1b0] sm:$0xff] }
  0x27   :  { %533 = vmatprep.subr.bf16.mxu0 %v231_v52  ;;  %444 = vmatprep.mubr.bf16.mxu1 %v349_v23  ;;  %v128_v41 = vld [vmem:[%s1761_s0 + $0x3a0] sm:$0xff]  ;;  %v239_v42 = vpack.c.bf16 %v131_v35, %v129_v34  ;;  %v130_v43 = vld [vmem:[%s1761_s0 + $0x3b0] sm:$0xff]  ;;  %v69_v44 = vld [vmem:[%s1761_s0 + $0x1c8] sm:$0xff]  ;;  %v206_v48 = vpack.c.bf16 %v66_v40, %v64_v39 }
  0x28   :  { %547 = vmatprep.mubr.bf16.mxu0 %v351_v24  ;;  %v71_v45 = vld [vmem:[%s1761_s0 + $0x1d8] sm:$0xff]  ;;  %v133_v46 = vld [vmem:[%s1761_s0 + $0x3c8] sm:$0xff]  ;;  %v238_v49 = vpack.c.bf16 %v130_v43, %v128_v41  ;;  %v68_v51 = vld [vmem:[%s1761_s0 + $0x1c0] sm:$0xff] }
  0x29   :  { %431 = vmatpush1.bf16.msra.mxu1 %v198_v58  ;;  %v135_v47 = vld [vmem:[%s1761_s0 + $0x3d8] sm:$0xff]  ;;  %v209_v50 = vpack.c.bf16 %v71_v45, %v69_v44  ;;  %v70_v52 = vld [vmem:[%s1761_s0 + $0x1d0] sm:$0xff]  ;;  %v132_v53 = vld [vmem:[%s1761_s0 + $0x3c0] sm:$0xff] }
  0x2a   :  { %534 = vmatpush1.bf16.msra.mxu0 %v230_v59  ;;  %432 = vmatprep.subr.bf16.mxu1 %v201_v60  ;;  %v241_v54 = vpack.c.bf16 %v135_v47, %v133_v46  ;;  %v134_v55 = vld [vmem:[%s1761_s0 + $0x3d0] sm:$0xff]  ;;  %v73_v56 = vld [vmem:[%s1761_s0 + $0x1e8] sm:$0xff]  ;;  %v75_v57 = vld [vmem:[%s1761_s0 + $0x1f8] sm:$0xff]  ;;  %v208_v60 = vpack.c.bf16 %v70_v52, %v68_v51 }
  0x2b   :  { %535 = vmatprep.subr.bf16.mxu0 %v233_v0  ;;  %v137_v58 = vld [vmem:[%s1761_s0 + $0x3e8] sm:$0xff]  ;;  %v139_v59 = vld [vmem:[%s1761_s0 + $0x3f8] sm:$0xff]  ;;  %v240_v61 = vpack.c.bf16 %v134_v55, %v132_v53  ;;  %v211_v62 = vpack.c.bf16 %v75_v57, %v73_v56  ;;  %v72_v63 = vld [vmem:[%s1761_s0 + $0x1e0] sm:$0xff] }
  0x2c   :  { %v74_v0 = vld [vmem:[%s1761_s0 + $0x1f0] sm:$0xff]  ;;  %v136_v1 = vld [vmem:[%s1761_s0 + $0x3e0] sm:$0xff]  ;;  %v243_v2 = vpack.c.bf16 %v139_v59, %v137_v58  ;;  %v141_v4 = vld [vmem:[%s1761_s0 + $0x408] sm:$0xff] }
  0x2d   :  { %433 = vmatpush1.bf16.msra.mxu1 %v200_v6  ;;  %v138_v3 = vld [vmem:[%s1761_s0 + $0x3f0] sm:$0xff]  ;;  %v143_v5 = vld [vmem:[%s1761_s0 + $0x418] sm:$0xff]  ;;  %v264_v6 = vld [vmem:[%s1762_s1] sm:$0xff]  ;;  %v210_v7 = vpack.c.bf16 %v74_v0, %v72_v63 }
  0x2e   :  { %536 = vmatpush1.bf16.msra.mxu0 %v232_v10  ;;  %434 = vmatprep.subr.bf16.mxu1 %v203_v11  ;;  %v270_v8 = vld [vmem:[%s1762_s1 + $0x30] sm:$0xff]  ;;  %v272_v10 = vld [vmem:[%s1762_s1 + $0x40] sm:$0xff]  ;;  %v242_v11 = vpack.c.bf16 %v138_v3, %v136_v1  ;;  %v245_v12 = vpack.c.bf16 %v143_v5, %v141_v4  ;;  %v277_v14 = vld [vmem:[%s1762_s1 + $0x68] sm:$0xff] }
  0x2f   :  { %537 = vmatprep.subr.bf16.mxu0 %v235_v15  ;;  %v266_v9 = vld [vmem:[%s1762_s1 + $0x10] sm:$0xff]  ;;  %v140_v13 = vld [vmem:[%s1761_s0 + $0x400] sm:$0xff]  ;;  %v283_v15 = vld [vmem:[%s1762_s1 + $0x98] sm:$0xff]  ;;  %v348_v19 = vpack.c.bf16 %v270_v8, %v264_v6 }
  0x30   :  { %v142_v16 = vld [vmem:[%s1761_s0 + $0x410] sm:$0xff]  ;;  %v279_v17 = vld [vmem:[%s1762_s1 + $0x78] sm:$0xff]  ;;  %v285_v18 = vld [vmem:[%s1762_s1 + $0xa8] sm:$0xff]  ;;  %v355_v23 = vpack.c.bf16 %v283_v15, %v277_v14 }
  0x31   :  { %435 = vmatpush1.bf16.msra.mxu1 %v202_v22  ;;  %v145_v20 = vld [vmem:[%s1761_s0 + $0x428] sm:$0xff]  ;;  %v147_v21 = vld [vmem:[%s1761_s0 + $0x438] sm:$0xff]  ;;  %v350_v22 = vpack.c.bf16 %v272_v10, %v266_v9  ;;  %v244_v24 = vpack.c.bf16 %v142_v16, %v140_v13  ;;  %v144_v27 = vld [vmem:[%s1761_s0 + $0x420] sm:$0xff] }
  0x32   :  { %538 = vmatpush1.bf16.msra.mxu0 %v234_v25  ;;  %436 = vmatprep.subr.bf16.mxu1 %v205_v26  ;;  %v357_v25 = vpack.c.bf16 %v285_v18, %v279_v17  ;;  %v247_v26 = vpack.c.bf16 %v147_v21, %v145_v20  ;;  %v146_v28 = vld [vmem:[%s1761_s0 + $0x430] sm:$0xff]  ;;  %v276_v29 = vld [vmem:[%s1762_s1 + $0x60] sm:$0xff]  ;;  %v151_v31 = vld [vmem:[%s1761_s0 + $0x458] sm:$0xff] }
  0x33   :  { %539 = vmatprep.subr.bf16.mxu0 %v237_v30  ;;  %v149_v30 = vld [vmem:[%s1761_s0 + $0x448] sm:$0xff]  ;;  %v282_v32 = vld [vmem:[%s1762_s1 + $0x90] sm:$0xff]  ;;  %v284_v34 = vld [vmem:[%s1762_s1 + $0xa0] sm:$0xff]  ;;  %v246_v35 = vpack.c.bf16 %v146_v28, %v144_v27 }
  0x34   :  { %v278_v33 = vld [vmem:[%s1762_s1 + $0x70] sm:$0xff]  ;;  %v249_v39 = vpack.c.bf16 %v151_v31, %v149_v30  ;;  %v291_v41 = vld [vmem:[%s1762_s1 + $0xd8] sm:$0xff]  ;;  %v354_v43 = vpack.c.bf16 %v282_v32, %v276_v29  ;;  %v153_v44 = vld [vmem:[%s1761_s0 + $0x468] sm:$0xff] }
  0x35   :  { %437 = vmatpush1.bf16.msra.mxu1 %v204_v36  ;;  %v148_v36 = vld [vmem:[%s1761_s0 + $0x440] sm:$0xff]  ;;  %v150_v40 = vld [vmem:[%s1761_s0 + $0x450] sm:$0xff]  ;;  %v155_v45 = vld [vmem:[%s1761_s0 + $0x478] sm:$0xff]  ;;  %v356_v46 = vpack.c.bf16 %v284_v34, %v278_v33 }
  0x36   :  { %540 = vmatpush1.bf16.msra.mxu0 %v236_v37  ;;  %438 = vmatprep.subr.bf16.mxu1 %v207_v38  ;;  %v289_v37 = vld [vmem:[%s1762_s1 + $0xc8] sm:$0xff]  ;;  %v295_v38 = vld [vmem:[%s1762_s1 + $0xf8] sm:$0xff]  ;;  %v152_v51 = vld [vmem:[%s1761_s0 + $0x460] sm:$0xff] }
  0x37   :  { %541 = vmatprep.subr.bf16.mxu0 %v239_v42  ;;  %v297_v42 = vld [vmem:[%s1762_s1 + $0x108] sm:$0xff]  ;;  %v361_v47 = vpack.c.bf16 %v295_v38, %v289_v37  ;;  %v154_v52 = vld [vmem:[%s1761_s0 + $0x470] sm:$0xff]  ;;  %v288_v53 = vld [vmem:[%s1762_s1 + $0xc0] sm:$0xff] }
  0x38   :  { %v159_v55 = vld [vmem:[%s1761_s0 + $0x498] sm:$0xff]  ;;  %v294_v56 = vld [vmem:[%s1762_s1 + $0xf0] sm:$0xff]  ;;  %v296_v58 = vld [vmem:[%s1762_s1 + $0x100] sm:$0xff]  ;;  %v250_v59 = vpack.c.bf16 %v154_v52, %v152_v51 }
  0x39   :  { %439 = vmatpush1.bf16.msra.mxu1 %v206_v48  ;;  %v248_v48 = vpack.c.bf16 %v150_v40, %v148_v36  ;;  %v290_v57 = vld [vmem:[%s1762_s1 + $0xd0] sm:$0xff]  ;;  %v309_v63 = vld [vmem:[%s1762_s1 + $0x168] sm:$0xff]  ;;  %v156_v1 = vld [vmem:[%s1761_s0 + $0x480] sm:$0xff]  ;;  %v360_v3 = vpack.c.bf16 %v294_v56, %v288_v53 }
  0x3a   :  { %542 = vmatpush1.bf16.msra.mxu0 %v238_v49  ;;  %440 = vmatprep.subr.bf16.mxu1 %v209_v50  ;;  %v363_v49 = vpack.c.bf16 %v297_v42, %v291_v41  ;;  %v251_v50 = vpack.c.bf16 %v155_v45, %v153_v44  ;;  %v161_v4 = vld [vmem:[%s1761_s0 + $0x4a8] sm:$0xff]  ;;  %v163_v5 = vld [vmem:[%s1761_s0 + $0x4b8] sm:$0xff]  ;;  %v362_v6 = vpack.c.bf16 %v296_v58, %v290_v57  ;;  %v300_v13 = vld [vmem:[%s1762_s1 + $0x120] sm:$0xff] }
  0x3b   :  { %543 = vmatprep.subr.bf16.mxu0 %v241_v54  ;;  %v157_v54 = vld [vmem:[%s1761_s0 + $0x488] sm:$0xff]  ;;  %v255_v10 = vpack.c.bf16 %v163_v5, %v161_v4  ;;  %v167_v15 = vld [vmem:[%s1761_s0 + $0x4d8] sm:$0xff]  ;;  %v306_v16 = vld [vmem:[%s1762_s1 + $0x150] sm:$0xff] }
  0x3c   :  { %v253_v0 = vpack.c.bf16 %v159_v55, %v157_v54  ;;  %v165_v14 = vld [vmem:[%s1761_s0 + $0x4c8] sm:$0xff]  ;;  %v302_v17 = vld [vmem:[%s1762_s1 + $0x130] sm:$0xff]  ;;  %v308_v18 = vld [vmem:[%s1762_s1 + $0x160] sm:$0xff]  ;;  %v366_v27 = vpack.c.bf16 %v306_v16, %v300_v13 }
  0x3d   :  { %441 = vmatpush1.bf16.msra.mxu1 %v208_v60  ;;  %v301_v60 = vld [vmem:[%s1762_s1 + $0x128] sm:$0xff]  ;;  %v319_v21 = vld [vmem:[%s1762_s1 + $0x1b8] sm:$0xff]  ;;  %v368_v30 = vpack.c.bf16 %v308_v18, %v302_v17  ;;  %v170_v36 = vld [vmem:[%s1761_s0 + $0x4f0] sm:$0xff] }
  0x3e   :  { %544 = vmatpush1.bf16.msra.mxu0 %v240_v61  ;;  %442 = vmatprep.subr.bf16.mxu1 %v211_v62  ;;  %v307_v61 = vld [vmem:[%s1762_s1 + $0x158] sm:$0xff]  ;;  %v313_v20 = vld [vmem:[%s1762_s1 + $0x188] sm:$0xff]  ;;  %v312_v37 = vld [vmem:[%s1762_s1 + $0x180] sm:$0xff] }
  0x3f   :  { %545 = vmatprep.subr.bf16.mxu0 %v243_v2  ;;  %v303_v62 = vld [vmem:[%s1762_s1 + $0x138] sm:$0xff]  ;;  %v158_v2 = vld [vmem:[%s1761_s0 + $0x490] sm:$0xff]  ;;  %v169_v28 = vld [vmem:[%s1761_s0 + $0x4e8] sm:$0xff]  ;;  %v373_v31 = vpack.c.bf16 %v319_v21, %v313_v20 }
  0x40   :  { %v369_v8 = vpack.c.bf16 %v309_v63, %v303_v62  ;;  %v252_v9 = vpack.c.bf16 %v158_v2, %v156_v1  ;;  %v171_v29 = vld [vmem:[%s1761_s0 + $0x4f8] sm:$0xff]  ;;  %v173_v38 = vld [vmem:[%s1761_s0 + $0x508] sm:$0xff]  ;;  %v318_v40 = vld [vmem:[%s1762_s1 + $0x1b0] sm:$0xff] }
  0x41   :  { %443 = vmatpush1.bf16.msra.mxu1 %v210_v7  ;;  %v367_v7 = vpack.c.bf16 %v307_v61, %v301_v60  ;;  %v259_v34 = vpack.c.bf16 %v171_v29, %v169_v28  ;;  %v314_v41 = vld [vmem:[%s1762_s1 + $0x190] sm:$0xff]  ;;  %v320_v42 = vld [vmem:[%s1762_s1 + $0x1c0] sm:$0xff]  ;;  %v331_v44 = vld [vmem:[%s1762_s1 + $0x218] sm:$0xff]  ;;  %v372_v51 = vpack.c.bf16 %v318_v40, %v312_v37 }
  0x42   :  { %546 = vmatpush1.bf16.msra.mxu0 %v242_v11  ;;  %761 = vmatprep.subr.bf16.mxu1 %v245_v12  ;;  %v160_v11 = vld [vmem:[%s1761_s0 + $0x4a0] sm:$0xff]  ;;  %v327_v45 = vld [vmem:[%s1762_s1 + $0x1f8] sm:$0xff]  ;;  %v177_v52 = vld [vmem:[%s1761_s0 + $0x528] sm:$0xff]  ;;  %v374_v54 = vpack.c.bf16 %v320_v42, %v314_v41 }
  0x43   :  { %618 = vmatprep.subr.bf16.mxu0 %v245_v12  ;;  %v162_v12 = vld [vmem:[%s1761_s0 + $0x4b0] sm:$0xff]  ;;  %v179_v53 = vld [vmem:[%s1761_s0 + $0x538] sm:$0xff]  ;;  %v324_v61 = vld [vmem:[%s1762_s1 + $0x1e0] sm:$0xff] }
  0x44   :  { %445 = vmatmul.mubr.bf16.vlgmr.msra.gmra.mrb[0].mxu1 %v348_v19  ;;  %v254_v19 = vpack.c.bf16 %v162_v12, %v160_v11  ;;  %v263_v58 = vpack.c.bf16 %v179_v53, %v177_v52  ;;  %v178_v60 = vld [vmem:[%s1761_s0 + $0x530] sm:$0xff]  ;;  %v337_v1 = vld [vmem:[%s1762_s1 + $0x248] sm:$0xff]  ;;  %v343_v2 = vld [vmem:[%s1762_s1 + $0x278] sm:$0xff] }
  0x45   :  { %548 = vmatmul.mubr.bf16.vlgmr.msra.gmra.mrb[0].mxu0 %v350_v22  ;;  %454 = vmatprep.mubr.bf16.mxu1 %v355_v23  ;;  %v315_v22 = vld [vmem:[%s1762_s1 + $0x198] sm:$0xff]  ;;  %v321_v23 = vld [vmem:[%s1762_s1 + $0x1c8] sm:$0xff]  ;;  %v330_v62 = vld [vmem:[%s1762_s1 + $0x210] sm:$0xff] }
  0x46   :  { %619 = vmatpush1.bf16.msra.mxu0 %v244_v24  ;;  %557 = vmatprep.mubr.bf16.mxu0 %v357_v25  ;;  %v164_v25 = vld [vmem:[%s1761_s0 + $0x4c0] sm:$0xff]  ;;  %v375_v32 = vpack.c.bf16 %v321_v23, %v315_v22  ;;  %v326_v63 = vld [vmem:[%s1762_s1 + $0x1f0] sm:$0xff]  ;;  %v339_v4 = vld [vmem:[%s1762_s1 + $0x258] sm:$0xff] }
  0x47   :  { %620 = vmatprep.subr.bf16.mxu0 %v247_v26  ;;  %771 = vmatpush1.bf16.msra.mxu1 %v244_v24  ;;  %v257_v24 = vpack.c.bf16 %v167_v15, %v165_v14  ;;  %v345_v5 = vld [vmem:[%s1762_s1 + $0x288] sm:$0xff]  ;;  %v342_v11 = vld [vmem:[%s1762_s1 + $0x270] sm:$0xff]  ;;  %v344_v13 = vld [vmem:[%s1762_s1 + $0x280] sm:$0xff] }
  0x48   :  { %762 = vmatprep.subr.bf16.mxu1 %v247_v26  ;;  %v166_v26 = vld [vmem:[%s1761_s0 + $0x4d0] sm:$0xff]  ;;  %v317_v14 = vld [vmem:[%s1762_s1 + $0x1a8] sm:$0xff]  ;;  %v323_v15 = vld [vmem:[%s1762_s1 + $0x1d8] sm:$0xff] }
  0x49   :  { %v256_v33 = vpack.c.bf16 %v166_v26, %v164_v25  ;;  %v338_v12 = vld [vmem:[%s1762_s1 + $0x250] sm:$0xff]  ;;  %v269_v16 = vld [vmem:[%s1762_s1 + $0x28] sm:$0xff]  ;;  %v275_v17 = vld [vmem:[%s1762_s1 + $0x58] sm:$0xff]  ;;  %v377_v20 = vpack.c.bf16 %v323_v15, %v317_v14 }
  0x4a   :  { %621 = vmatpush1.bf16.msra.mxu0 %v246_v35  ;;  %v353_v21 = vpack.c.bf16 %v275_v17, %v269_v16  ;;  %v268_v22 = vld [vmem:[%s1762_s1 + $0x20] sm:$0xff]  ;;  %v274_v25 = vld [vmem:[%s1762_s1 + $0x50] sm:$0xff]  ;;  %v329_v26 = vld [vmem:[%s1762_s1 + $0x208] sm:$0xff] }
  0x4b   :  { %622 = vmatprep.subr.bf16.mxu0 %v249_v39  ;;  %772 = vmatpush1.bf16.msra.mxu1 %v246_v35  ;;  %v168_v35 = vld [vmem:[%s1761_s0 + $0x4e0] sm:$0xff]  ;;  %v281_v28 = vld [vmem:[%s1762_s1 + $0x88] sm:$0xff]  ;;  %v287_v29 = vld [vmem:[%s1762_s1 + $0xb8] sm:$0xff] }
  0x4c   :  { %455 = vmatmul.mubr.bf16.gmra.mrb[4].mxu1 %v354_v43  ;;  %763 = vmatprep.subr.bf16.mxu1 %v249_v39  ;;  %v175_v39 = vld [vmem:[%s1761_s0 + $0x518] sm:$0xff]  ;;  %v325_v43 = vld [vmem:[%s1762_s1 + $0x1e8] sm:$0xff]  ;;  %v316_v23 = vld [vmem:[%s1762_s1 + $0x1a0] sm:$0xff] }
  0x4d   :  { %558 = vmatmul.mubr.bf16.gmra.mrb[4].mxu0 %v356_v46  ;;  %464 = vmatprep.mubr.bf16.mxu1 %v361_v47  ;;  %v258_v46 = vpack.c.bf16 %v170_v36, %v168_v35  ;;  %v333_v47 = vld [vmem:[%s1762_s1 + $0x228] sm:$0xff]  ;;  %v379_v55 = vpack.c.bf16 %v331_v44, %v325_v43  ;;  %v328_v35 = vld [vmem:[%s1762_s1 + $0x200] sm:$0xff]  ;;  %v334_v36 = vld [vmem:[%s1762_s1 + $0x230] sm:$0xff] }
  0x4e   :  { %623 = vmatpush1.bf16.msra.mxu0 %v248_v48  ;;  %567 = vmatprep.mubr.bf16.mxu0 %v363_v49  ;;  %v172_v49 = vld [vmem:[%s1761_s0 + $0x500] sm:$0xff]  ;;  %v381_v56 = vpack.c.bf16 %v333_v47, %v327_v45  ;;  %v286_v37 = vld [vmem:[%s1762_s1 + $0xb0] sm:$0xff]  ;;  %v293_v40 = vld [vmem:[%s1762_s1 + $0xe8] sm:$0xff]  ;;  %v382_v42 = vpack.c.bf16 %v334_v36, %v328_v35 }
  0x4f   :  { %624 = vmatprep.subr.bf16.mxu0 %v251_v50  ;;  %773 = vmatpush1.bf16.msra.mxu1 %v248_v48  ;;  %v261_v48 = vpack.c.bf16 %v175_v39, %v173_v38  ;;  %v341_v38 = vld [vmem:[%s1762_s1 + $0x268] sm:$0xff]  ;;  %v347_v39 = vld [vmem:[%s1762_s1 + $0x298] sm:$0xff]  ;;  %v346_v47 = vld [vmem:[%s1762_s1 + $0x290] sm:$0xff] }
  0x50   :  { %764 = vmatprep.subr.bf16.mxu1 %v251_v50  ;;  %v174_v50 = vld [vmem:[%s1761_s0 + $0x510] sm:$0xff]  ;;  %v299_v41 = vld [vmem:[%s1762_s1 + $0x118] sm:$0xff]  ;;  %v389_v44 = vpack.c.bf16 %v347_v39, %v341_v38 }
  0x51   :  { %v260_v57 = vpack.c.bf16 %v174_v50, %v172_v49  ;;  %v365_v45 = vpack.c.bf16 %v299_v41, %v293_v40  ;;  %v298_v49 = vld [vmem:[%s1762_s1 + $0x110] sm:$0xff]  ;;  %v305_v50 = vld [vmem:[%s1762_s1 + $0x148] sm:$0xff] }
  0x52   :  { %625 = vmatpush1.bf16.msra.mxu0 %v250_v59 }
  0x53   :  { %626 = vmatprep.subr.bf16.mxu0 %v253_v0  ;;  %774 = vmatpush1.bf16.msra.mxu1 %v250_v59  ;;  %v176_v59 = vld [vmem:[%s1761_s0 + $0x520] sm:$0xff] }
  0x54   :  { %465 = vmatmul.mubr.bf16.gmra.mrb[8].mxu1 %v360_v3  ;;  %765 = vmatprep.subr.bf16.mxu1 %v253_v0  ;;  %v332_v0 = vld [vmem:[%s1762_s1 + $0x220] sm:$0xff]  ;;  %v262_v3 = vpack.c.bf16 %v178_v60, %v176_v59 }
  0x55   :  { %568 = vmatmul.mubr.bf16.gmra.mrb[8].mxu0 %v362_v6  ;;  %474 = vmatprep.mubr.bf16.mxu1 %v367_v7  ;;  %v378_v6 = vpack.c.bf16 %v330_v62, %v324_v61  ;;  %v380_v7 = vpack.c.bf16 %v332_v0, %v326_v63 }
  0x56   :  { %577 = vmatprep.mubr.bf16.mxu0 %v369_v8  ;;  %627 = vmatpush1.bf16.msra.mxu0 %v252_v9  ;;  %v385_v8 = vpack.c.bf16 %v343_v2, %v337_v1 }
  0x57   :  { %628 = vmatprep.subr.bf16.mxu0 %v255_v10  ;;  %775 = vmatpush1.bf16.msra.mxu1 %v252_v9  ;;  %v387_v9 = vpack.c.bf16 %v345_v5, %v339_v4 }
  0x58   :  { %766 = vmatprep.subr.bf16.mxu1 %v255_v10  ;;  %v336_v10 = vld [vmem:[%s1762_s1 + $0x240] sm:$0xff] }
  0x59   :  { %v384_v18 = vpack.c.bf16 %v342_v11, %v336_v10 }
  0x5a   :  { %629 = vmatpush1.bf16.msra.mxu0 %v254_v19 }
  0x5b   :  { %630 = vmatprep.subr.bf16.mxu0 %v257_v24  ;;  %776 = vmatpush1.bf16.msra.mxu1 %v254_v19  ;;  %v386_v19 = vpack.c.bf16 %v344_v13, %v338_v12 }
  0x5c   :  { %475 = vmatmul.mubr.bf16.gmra.mrb[12].mxu1 %v366_v27  ;;  %767 = vmatprep.subr.bf16.mxu1 %v257_v24  ;;  %v322_v24 = vld [vmem:[%s1762_s1 + $0x1d0] sm:$0xff]  ;;  %v335_v27 = vld [vmem:[%s1762_s1 + $0x238] sm:$0xff] }
  0x5d   :  { %578 = vmatmul.mubr.bf16.gmra.mrb[12].mxu0 %v368_v30  ;;  %484 = vmatprep.mubr.bf16.mxu1 %v373_v31  ;;  %v376_v30 = vpack.c.bf16 %v322_v24, %v316_v23  ;;  %v352_v31 = vpack.c.bf16 %v274_v25, %v268_v22 }
  0x5e   :  { %587 = vmatprep.mubr.bf16.mxu0 %v375_v32  ;;  %631 = vmatpush1.bf16.msra.mxu0 %v256_v33  ;;  %v383_v32 = vpack.c.bf16 %v335_v27, %v329_v26 }
  0x5f   :  { %632 = vmatprep.subr.bf16.mxu0 %v259_v34  ;;  %777 = vmatpush1.bf16.msra.mxu1 %v256_v33  ;;  %v359_v33 = vpack.c.bf16 %v287_v29, %v281_v28 }
  0x60   :  { %768 = vmatprep.subr.bf16.mxu1 %v259_v34  ;;  %v280_v34 = vld [vmem:[%s1762_s1 + $0x80] sm:$0xff] }
  0x61   :  { %v358_v43 = vpack.c.bf16 %v286_v37, %v280_v34 }
  0x62   :  { %633 = vmatpush1.bf16.msra.mxu0 %v258_v46 }
  0x63   :  { %778 = vmatpush1.bf16.msra.mxu1 %v258_v46  ;;  %634 = vmatprep.subr.bf16.mxu0 %v261_v48  ;;  %v340_v46 = vld [vmem:[%s1762_s1 + $0x260] sm:$0xff] }
  0x64   :  { %485 = vmatmul.mubr.bf16.gmra.mrb[16].mxu1 %v372_v51  ;;  %769 = vmatprep.subr.bf16.mxu1 %v261_v48  ;;  %v292_v48 = vld [vmem:[%s1762_s1 + $0xe0] sm:$0xff]  ;;  %v311_v51 = vld [vmem:[%s1762_s1 + $0x178] sm:$0xff]  ;;  %v388_v52 = vpack.c.bf16 %v346_v47, %v340_v46 }
  0x65   :  { %588 = vmatmul.mubr.bf16.gmra.mrb[16].mxu0 %v374_v54  ;;  %494 = vmatprep.mubr.bf16.mxu1 %v379_v55  ;;  %v364_v53 = vpack.c.bf16 %v298_v49, %v292_v48  ;;  %v371_v54 = vpack.c.bf16 %v311_v51, %v305_v50  ;;  %v304_v55 = vld [vmem:[%s1762_s1 + $0x140] sm:$0xff] }
  0x66   :  { %597 = vmatprep.mubr.bf16.mxu0 %v381_v56  ;;  %635 = vmatpush1.bf16.msra.mxu0 %v260_v57  ;;  %v310_v56 = vld [vmem:[%s1762_s1 + $0x170] sm:$0xff] }
  0x67   :  { %779 = vmatpush1.bf16.msra.mxu1 %v260_v57  ;;  %636 = vmatprep.subr.bf16.mxu0 %v263_v58  ;;  %v370_v57 = vpack.c.bf16 %v310_v56, %v304_v55 }
  0x68   :  { %770 = vmatprep.subr.bf16.mxu1 %v263_v58 }
  0x6a   :  { %637 = vmatpush1.bf16.msra.mxu0 %v262_v3 }
  0x6b   :  { %780 = vmatpush1.bf16.msra.mxu1 %v262_v3 }
  0x6c   :  { %495 = vmatmul.mubr.bf16.gmra.mrb[20].mxu1 %v378_v6 }
  0x6d   :  { %598 = vmatmul.mubr.bf16.gmra.mrb[20].mxu0 %v380_v7  ;;  %504 = vmatprep.mubr.bf16.mxu1 %v385_v8 }
  0x6e   :  { %607 = vmatprep.mubr.bf16.mxu0 %v387_v9 }
  0x74   :  { %505 = vmatmul.mubr.bf16.gmra.mrb[24].mxu1 %v384_v18 }
  0x75   :  { %608 = vmatmul.mubr.bf16.gmra.mrb[24].mxu0 %v386_v19  ;;  %758 = vmatprep.mubr.msk.bf16.mxu1 %vm390_vm0, %v377_v20 }
  0x76   :  { %754 = vmatprep.mubr.msk.bf16.mxu0 %vm390_vm0, %v353_v21 }
  0x7c   :  { %691 = vmatmul.mubr.bf16.vlgmr.msra.gmra.mrb[28].mxu1 %v376_v30 }
  0x7d   :  { %651 = vmatmul.mubr.bf16.vlgmr.msra.gmra.mrb[0].mxu0 %v352_v31  ;;  %759 = vmatprep.mubr.msk.bf16.mxu1 %vm390_vm0, %v383_v32 }
  0x7e   :  { %755 = vmatprep.mubr.msk.bf16.mxu0 %vm390_vm0, %v359_v33 }
  0x84   :  { %701 = vmatmul.mubr.bf16.gmra.mrb[32].mxu1 %v382_v42 }
  0x85   :  { %661 = vmatmul.mubr.bf16.gmra.mrb[4].mxu0 %v358_v43  ;;  %760 = vmatprep.mubr.msk.bf16.mxu1 %vm390_vm0, %v389_v44 }
  0x86   :  { %756 = vmatprep.mubr.msk.bf16.mxu0 %vm390_vm0, %v365_v45 }
  0x8c   :  { %711 = vmatmul.mubr.bf16.gmra.mrb[36].mxu1 %v388_v52 }
  0x8d   :  { %671 = vmatmul.mubr.bf16.gmra.mrb[8].mxu0 %v364_v53 }
  0x8e   :  { %757 = vmatprep.mubr.msk.bf16.mxu0 %vm390_vm0, %v371_v54 }
  0x95   :  { %681 = vmatmul.mubr.bf16.gmra.mrb[12].mxu0 %v370_v57 }
 0x117   :  { %v446_v58 = vpop.f32.mrb[0].mxu1 }
 0x118   :  { %v448_v59 = vpop.f32.mrb[1].mxu1 }
 0x119   :  { %v1615_v60 = vpop.f32.mrb[2].mxu1 }
 0x11a   :  { %v1617_v61 = vpop.f32.mrb[3].mxu1 }
 0x11f   :  { %v1619_v62 = vpop.f32.mrb[4].mxu1 }
 0x120   :  { %v1621_v63 = vpop.f32.mrb[5].mxu1 }
 0x121   :  { %v1623_v0 = vpop.f32.mrb[6].mxu1 }
 0x122   :  { %v1625_v1 = vpop.f32.mrb[7].mxu1 }
 0x127   :  { %v1627_v2 = vpop.f32.mrb[8].mxu1 }
 0x128   :  { %v1629_v3 = vpop.f32.mrb[9].mxu1 }
 0x129   :  { %v1631_v4 = vpop.f32.mrb[10].mxu1 }
 0x12a   :  { %v1633_v5 = vpop.f32.mrb[11].mxu1 }
 0x12f   :  { %v1635_v6 = vpop.f32.mrb[12].mxu1 }
 0x130   :  { %v1637_v7 = vpop.f32.mrb[13].mxu1 }
 0x131   :  { %v1639_v8 = vpop.f32.mrb[14].mxu1 }
 0x132   :  { %v1641_v9 = vpop.f32.mrb[15].mxu1 }
 0x137   :  { %v486_v10 = vpop.f32.mrb[16].mxu1 }
 0x138   :  { %v589_v11 = vpop.f32.mrb[16].mxu0  ;;  %v488_v12 = vpop.f32.mrb[17].mxu1 }
 0x139   :  { %v590_v13 = vadd.f32 %v589_v11, %v486_v10  ;;  %v591_v14 = vpop.f32.mrb[17].mxu0  ;;  %v490_v15 = vpop.f32.mrb[18].mxu1 }
 0x13a   :  { %v592_v16 = vadd.f32 %v591_v14, %v488_v12  ;;  %v593_v17 = vpop.f32.mrb[18].mxu0  ;;  %v492_v18 = vpop.f32.mrb[19].mxu1 }
 0x13b   :  { %v594_v19 = vadd.f32 %v593_v17, %v490_v15  ;;  %v595_v20 = vpop.f32.mrb[19].mxu0 }
 0x13c   :  { %v596_v21 = vadd.f32 %v595_v20, %v492_v18 }
 0x13f   :  { %v496_v22 = vpop.f32.mrb[20].mxu1 }
 0x140   :  { %v599_v23 = vpop.f32.mrb[20].mxu0  ;;  %v498_v24 = vpop.f32.mrb[21].mxu1 }
 0x141   :  { %v600_v25 = vadd.f32 %v599_v23, %v496_v22  ;;  %v601_v26 = vpop.f32.mrb[21].mxu0  ;;  %v500_v27 = vpop.f32.mrb[22].mxu1 }
 0x142   :  { %v602_v28 = vadd.f32 %v601_v26, %v498_v24  ;;  %v603_v29 = vpop.f32.mrb[22].mxu0  ;;  %v502_v30 = vpop.f32.mrb[23].mxu1 }
 0x143   :  { %v604_v31 = vadd.f32 %v603_v29, %v500_v27  ;;  %v605_v32 = vpop.f32.mrb[23].mxu0 }
 0x144   :  { %v606_v33 = vadd.f32 %v605_v32, %v502_v30 }
 0x147   :  { %v506_v34 = vpop.f32.mrb[24].mxu1 }
 0x148   :  { %v609_v35 = vpop.f32.mrb[24].mxu0  ;;  %v508_v36 = vpop.f32.mrb[25].mxu1 }
 0x149   :  { %v610_v37 = vadd.f32 %v609_v35, %v506_v34  ;;  %v611_v38 = vpop.f32.mrb[25].mxu0  ;;  %v510_v39 = vpop.f32.mrb[26].mxu1 }
 0x14a   :  { %v612_v40 = vadd.f32 %v611_v38, %v508_v36  ;;  %v613_v41 = vpop.f32.mrb[26].mxu0  ;;  %v512_v42 = vpop.f32.mrb[27].mxu1 }
 0x14b   :  { %v1643_v43 = vadd.f32 %v613_v41, %v510_v39  ;;  %v615_v44 = vpop.f32.mrb[27].mxu0 }
 0x14c   :  { %v1645_v45 = vadd.f32 %v615_v44, %v512_v42 }
 0x14f   :  { %v692_v46 = vpop.f32.mrb[28].mxu1 }
 0x150   :  { %v652_v47 = vpop.f32.mrb[0].mxu0  ;;  %v693_v48 = vadd.f32 %v692_v46, %v590_v13  ;;  %v694_v49 = vpop.f32.mrb[29].mxu1 }
 0x151   :  { %v781_v50 = vadd.f32 %v652_v47, %v446_v58  ;;  %v654_v51 = vpop.f32.mrb[1].mxu0  ;;  %v695_v52 = vadd.f32 %v694_v49, %v592_v16  ;;  %v696_v53 = vpop.f32.mrb[30].mxu1 }
 0x152   :  { %738 = vst [vmem:[%s1763_s2 + $0x80] sm:$0xff] %v693_v48  ;;  %v782_v54 = vadd.f32 %v654_v51, %v448_v59  ;;  %v656_v55 = vpop.f32.mrb[2].mxu0  ;;  %v697_v56 = vadd.f32 %v696_v53, %v594_v19  ;;  %v698_v57 = vpop.f32.mrb[31].mxu1 }
 0x153   :  { %721 = vst [vmem:[%s1763_s2] sm:$0xff] %v781_v50  ;;  %739 = vst.msk [vmem:[%s1763_s2 + $0x88] sm:$0xff] %vm722_vm1, %v695_v52  ;;  %v783_v58 = vadd.f32 %v656_v55, %v1615_v60  ;;  %v658_v10 = vpop.f32.mrb[3].mxu0  ;;  %v699_v11 = vadd.f32 %v698_v57, %v596_v21 }
 0x154   :  { %723 = vst.msk [vmem:[%s1763_s2 + $0x8] sm:$0xff] %vm722_vm1, %v782_v54  ;;  %740 = vst [vmem:[%s1763_s2 + $0x90] sm:$0xff] %v697_v56  ;;  %v784_v59 = vadd.f32 %v658_v10, %v1617_v61 }
 0x155   :  { %724 = vst [vmem:[%s1763_s2 + $0x10] sm:$0xff] %v783_v58  ;;  %741 = vst.msk [vmem:[%s1763_s2 + $0x98] sm:$0xff] %vm722_vm1, %v699_v11 }
 0x156   :  { %725 = vst.msk [vmem:[%s1763_s2 + $0x18] sm:$0xff] %vm722_vm1, %v784_v59 }
 0x157   :  { %v702_v60 = vpop.f32.mrb[32].mxu1 }
 0x158   :  { %v662_v12 = vpop.f32.mrb[4].mxu0  ;;  %v703_v13 = vadd.f32 %v702_v60, %v600_v25  ;;  %v704_v14 = vpop.f32.mrb[33].mxu1 }
 0x159   :  { %v785_v61 = vadd.f32 %v662_v12, %v1619_v62  ;;  %v664_v15 = vpop.f32.mrb[5].mxu0  ;;  %v705_v16 = vadd.f32 %v704_v14, %v602_v28  ;;  %v706_v17 = vpop.f32.mrb[34].mxu1 }
 0x15a   :  { %742 = vst [vmem:[%s1763_s2 + $0xa0] sm:$0xff] %v703_v13  ;;  %v786_v18 = vadd.f32 %v664_v15, %v1621_v63  ;;  %v666_v19 = vpop.f32.mrb[6].mxu0  ;;  %v707_v20 = vadd.f32 %v706_v17, %v604_v31  ;;  %v708_v21 = vpop.f32.mrb[35].mxu1 }
 0x15b   :  { %726 = vst [vmem:[%s1763_s2 + $0x20] sm:$0xff] %v785_v61  ;;  %743 = vst.msk [vmem:[%s1763_s2 + $0xa8] sm:$0xff] %vm722_vm1, %v705_v16  ;;  %v787_v62 = vadd.f32 %v666_v19, %v1623_v0  ;;  %v668_v22 = vpop.f32.mrb[7].mxu0  ;;  %v709_v23 = vadd.f32 %v708_v21, %v606_v33 }
 0x15c   :  { %727 = vst.msk [vmem:[%s1763_s2 + $0x28] sm:$0xff] %vm722_vm1, %v786_v18  ;;  %744 = vst [vmem:[%s1763_s2 + $0xb0] sm:$0xff] %v707_v20  ;;  %v788_v63 = vadd.f32 %v668_v22, %v1625_v1 }
 0x15d   :  { %728 = vst [vmem:[%s1763_s2 + $0x30] sm:$0xff] %v787_v62  ;;  %745 = vst.msk [vmem:[%s1763_s2 + $0xb8] sm:$0xff] %vm722_vm1, %v709_v23 }
 0x15e   :  { %729 = vst.msk [vmem:[%s1763_s2 + $0x38] sm:$0xff] %vm722_vm1, %v788_v63 }
 0x15f   :  { %v712_v0 = vpop.f32.mrb[36].mxu1 }
 0x160   :  { %v672_v24 = vpop.f32.mrb[8].mxu0  ;;  %v713_v25 = vadd.f32 %v712_v0, %v610_v37  ;;  %v714_v26 = vpop.f32.mrb[37].mxu1 }
 0x161   :  { %v789_v1 = vadd.f32 %v672_v24, %v1627_v2  ;;  %v674_v27 = vpop.f32.mrb[9].mxu0  ;;  %v715_v28 = vadd.f32 %v714_v26, %v612_v40  ;;  %v716_v29 = vpop.f32.mrb[38].mxu1 }
 0x162   :  { %746 = vst [vmem:[%s1763_s2 + $0xc0] sm:$0xff] %v713_v25  ;;  %v790_v30 = vadd.f32 %v674_v27, %v1629_v3  ;;  %v676_v31 = vpop.f32.mrb[10].mxu0  ;;  %v717_v32 = vadd.f32 %v716_v29, %v1643_v43  ;;  %v718_v33 = vpop.f32.mrb[39].mxu1 }
 0x163   :  { %730 = vst [vmem:[%s1763_s2 + $0x40] sm:$0xff] %v789_v1  ;;  %747 = vst.msk [vmem:[%s1763_s2 + $0xc8] sm:$0xff] %vm722_vm1, %v715_v28  ;;  %v791_v2 = vadd.f32 %v676_v31, %v1631_v4  ;;  %v678_v34 = vpop.f32.mrb[11].mxu0  ;;  %v719_v35 = vadd.f32 %v718_v33, %v1645_v45 }
 0x164   :  { %731 = vst.msk [vmem:[%s1763_s2 + $0x48] sm:$0xff] %vm722_vm1, %v790_v30  ;;  %748 = vst [vmem:[%s1763_s2 + $0xd0] sm:$0xff] %v717_v32  ;;  %v792_v3 = vadd.f32 %v678_v34, %v1633_v5 }
 0x165   :  { %732 = vst [vmem:[%s1763_s2 + $0x50] sm:$0xff] %v791_v2  ;;  %749 = vst.msk [vmem:[%s1763_s2 + $0xd8] sm:$0xff] %vm722_vm1, %v719_v35 }
 0x166   :  { %733 = vst.msk [vmem:[%s1763_s2 + $0x58] sm:$0xff] %vm722_vm1, %v792_v3 }
 0x168   :  { %v682_v4 = vpop.f32.mrb[12].mxu0 }
 0x169   :  { %v793_v36 = vadd.f32 %v682_v4, %v1635_v6  ;;  %v684_v37 = vpop.f32.mrb[13].mxu0 }
 0x16a   :  { %v794_v5 = vadd.f32 %v684_v37, %v1637_v7  ;;  %v686_v38 = vpop.f32.mrb[14].mxu0 }
 0x16b   :  { %734 = vst [vmem:[%s1763_s2 + $0x60] sm:$0xff] %v793_v36  ;;  %v795_v39 = vadd.f32 %v686_v38, %v1639_v8  ;;  %v688_v40 = vpop.f32.mrb[15].mxu0 }
 0x16c   :  { %735 = vst.msk [vmem:[%s1763_s2 + $0x68] sm:$0xff] %vm722_vm1, %v794_v5  ;;  %v796_v41 = vadd.f32 %v688_v40, %v1641_v9 }
 0x16d   :  { %736 = vst [vmem:[%s1763_s2 + $0x70] sm:$0xff] %v795_v39 }
 0x16e   :  { %737 = vst.msk [vmem:[%s1763_s2 + $0x78] sm:$0xff] %vm722_vm1, %v796_v41 }

</bundles_post_ra>
